<compile_context>
chip_gen: v5e
topology: v5e:2x2
jax: 0.10.0
libtpu: 0.0.40
codegen_flags: <defaults>
</compile_context>

<pallas_src>
import jax
import jax.numpy as jnp
from jax.experimental import pallas as pl
from jax.experimental.pallas import tpu as pltpu


# ---------------------------------------------------------------------------
# Kernel
# ---------------------------------------------------------------------------
def prior_kernel(c_ref, w12_ref, wh_ref, b12_ref, bh_ref, out_ref):
    C = c_ref.shape[1]  # static

    # fc1 + ReLU  (bf16 x bf16 -> f32 accumulate on the MXU; bias/ReLU in f32 on VPU)
    x = c_ref[...]
    if x.dtype != jnp.bfloat16:
        x = x.astype(jnp.bfloat16)
    h = jnp.dot(x, w12_ref[:C, :], preferred_element_type=jnp.float32)
    h = jnp.maximum(h + b12_ref[0:1, :], 0.0)

    # fc2 + ReLU
    h = jnp.dot(h.astype(jnp.bfloat16), w12_ref[C:, :],
                preferred_element_type=jnp.float32)
    h = jnp.maximum(h + b12_ref[1:2, :], 0.0)

    # fused, lane-padded [mu | logvar | 0-pad] head: one matmul, one full-width writeback
    out = jnp.dot(h.astype(jnp.bfloat16), wh_ref[...],
                  preferred_element_type=jnp.float32) + bh_ref[...]
    out_ref[...] = out.astype(out_ref.dtype)


# ---------------------------------------------------------------------------
# Wrapper
# ---------------------------------------------------------------------------
def prior_forward(c, params, z_dim, *, tile_b=None):
    """c: (B, C_embedded) float32 or bfloat16.

    params:
      w12    (C + 128, 128)   bfloat16   rows [0, C) = fc1 weight, rows [C, C+128) = fc2
      b12    (2, 128)         float32    row 0 = fc1 bias, row 1 = fc2 bias
      w_head (128, HEAD_PAD)  bfloat16   [mu weights | logvar weights | zero pad]
      b_head (1, HEAD_PAD)    float32    [mu bias | logvar bias | zero pad]

    Returns (mu, logvar), each (B, z_dim) float32.
    """
    B, C = c.shape
    H = params["b12"].shape[1]
    head_pad = params["w_head"].shape[1]

    # Batch-tile selection:
    #   * B <= 1024: single grid step (fewest steps; no padding; best on 1-TC v5e/v6e).
    #   * larger B : >= 2 big sublane-aligned tiles so the "parallel" axis can shard
    #     across v7x's two TensorCores while per-step overhead stays amortized.
    if tile_b is None:
        if B <= 1024:
            tile_b = B
        else:
            nb_target = max(2, pl.cdiv(B, 2048))
            tile_b = ((pl.cdiv(B, nb_target) + 7) // 8) * 8
    nb = pl.cdiv(B, tile_b)
    B_pad = nb * tile_b
    if B_pad != B:  # never hit on the single-step path (tile_b == B)
        c = jnp.pad(c, ((0, B_pad - B), (0, 0)))

    c_bytes = c.size * (2 if c.dtype == jnp.bfloat16 else 4)
    flops = 2 * B_pad * (C * H + H * H + H * head_pad)
    bytes_accessed = (
        c_bytes
        + params["w12"].size * 2 + params["w_head"].size * 2
        + params["b12"].size * 4 + params["b_head"].size * 4
        + B_pad * head_pad * 4
    )

    out = pl.pallas_call(
        prior_kernel,
        out_shape=jax.ShapeDtypeStruct((B_pad, head_pad), jnp.float32),
        grid_spec=pltpu.PrefetchScalarGridSpec(
            num_scalar_prefetch=0,
            grid=(nb,),
            in_specs=[
                pl.BlockSpec((tile_b, C),     lambda i: (i, 0)),  # c tile (streamed)
                pl.BlockSpec((C + H, H),      lambda i: (0, 0)),  # packed fc1|fc2 weight
                pl.BlockSpec((H, head_pad),   lambda i: (0, 0)),  # fused, padded head weight
                pl.BlockSpec((2, H),          lambda i: (0, 0)),  # packed fc1/fc2 biases
                pl.BlockSpec((1, head_pad),   lambda i: (0, 0)),  # fused, padded head bias
            ],
            out_specs=pl.BlockSpec((tile_b, head_pad), lambda i: (i, 0)),
        ),
        compiler_params=pltpu.CompilerParams(
            dimension_semantics=("parallel",),  # shards across v7x's 2 TCs when nb > 1
        ),
        cost_estimate=pl.CostEstimate(
            flops=flops, transcendentals=0, bytes_accessed=bytes_accessed),
    )(c, params["w12"], params["w_head"], params["b12"], params["b_head"])

    out = out[:B]
    return out[:, :z_dim], out[:, z_dim:2 * z_dim]


# ---------------------------------------------------------------------------
# Parameter init (mimics nn.Linear's U(-1/sqrt(fan_in), 1/sqrt(fan_in)))
# ---------------------------------------------------------------------------
def init_prior_params(key, c_embedded, z_dim, hidden=128):
    def linear(k, fan_in, fan_out):
        kw, kb = jax.random.split(k)
        bound = 1.0 / jnp.sqrt(fan_in)
        w = jax.random.uniform(kw, (fan_in, fan_out), jnp.float32, -bound, bound)
        b = jax.random.uniform(kb, (1, fan_out), jnp.float32, -bound, bound)
        return w, b

    k1, k2, k3, k4 = jax.random.split(key, 4)
    w1, b1 = linear(k1, c_embedded, hidden)
    w2, b2 = linear(k2, hidden, hidden)
    w_mu, b_mu = linear(k3, hidden, z_dim)
    w_lv, b_lv = linear(k4, hidden, z_dim)

    # Lane-dense head: pad [mu | logvar] out to a multiple of 128 columns with zeros.
    two_z = 2 * z_dim
    head_pad = max(128, ((two_z + 127) // 128) * 128)
    w_head = jnp.zeros((hidden, head_pad), jnp.float32)
    w_head = w_head.at[:, :z_dim].set(w_mu).at[:, z_dim:two_z].set(w_lv)
    b_head = jnp.zeros((1, head_pad), jnp.float32)
    b_head = b_head.at[:, :z_dim].set(b_mu).at[:, z_dim:two_z].set(b_lv)

    return {
        "w12": jnp.concatenate([w1, w2], axis=0).astype(jnp.bfloat16),  # (C+H, H)
        "b12": jnp.concatenate([b1, b2], axis=0),                       # (2, H)   f32
        "w_head": w_head.astype(jnp.bfloat16),                          # (H, pad) bf16
        "b_head": b_head,                                               # (1, pad) f32
    }


# ---------------------------------------------------------------------------
# Pure-JAX reference mirroring the kernel's numerics (bf16 operands, f32 accum)
# ---------------------------------------------------------------------------
def prior_reference(c, p, z_dim):
    bf16 = jnp.bfloat16
    C = c.shape[1]
    w1, w2 = p["w12"][:C], p["w12"][C:]
    h = jnp.dot(c.astype(bf16), w1, preferred_element_type=jnp.float32)
    h = jnp.maximum(h + p["b12"][0:1, :], 0.0)
    h = jnp.dot(h.astype(bf16), w2, preferred_element_type=jnp.float32)
    h = jnp.maximum(h + p["b12"][1:2, :], 0.0)
    out = jnp.dot(h.astype(bf16), p["w_head"],
                  preferred_element_type=jnp.float32) + p["b_head"]
    return out[:, :z_dim], out[:, z_dim:2 * z_dim]


if __name__ == "__main__":
    # Small shapes consistent with the module: batch=8, c_embedded=32, z_dim=16
    B, C_EMB, Z_DIM = 8, 32, 16

    key = jax.random.PRNGKey(0)
    k_params, k_c = jax.random.split(key)
    params = init_prior_params(k_params, C_EMB, Z_DIM)
    c = jax.random.normal(k_c, (B, C_EMB), dtype=jnp.float32)

    mu, logvar = prior_forward(c, params, Z_DIM)
    jax.block_until_ready((mu, logvar))

    mu_ref, logvar_ref = prior_reference(c, params, Z_DIM)
    assert mu.shape == (B, Z_DIM) and logvar.shape == (B, Z_DIM)
    assert jnp.allclose(mu, mu_ref, atol=1e-3, rtol=1e-3)
    assert jnp.allclose(logvar, logvar_ref, atol=1e-3, rtol=1e-3)

    print("KERNEL_OK")
</pallas_src>

<mosaic_0001>
module attributes {stable_mosaic.version = 11 : i64} {
  func.func @prior_kernel(%arg0: i32, %arg1: memref<8x32xf32, #tpu.memory_space<vmem>>, %arg2: memref<160x128xbf16, #tpu.memory_space<vmem>>, %arg3: memref<128x128xbf16, #tpu.memory_space<vmem>>, %arg4: memref<2x128xf32, #tpu.memory_space<vmem>>, %arg5: memref<1x128xf32, #tpu.memory_space<vmem>>, %arg6: memref<8x128xf32, #tpu.memory_space<vmem>>) attributes {dimension_semantics = [#tpu.dimension_semantics<parallel>], iteration_bounds = array<i64: 1>, scalar_prefetch = 0 : i64, scratch_operands = 0 : i64, tpu.core_type = #tpu.core_type<tc>, window_params = [{transform_indices = @transform_0, window_bounds = array<i64: 8, 32>}, {pipeline_mode = #tpu.pipeline_mode<synchronous>, transform_indices = @transform_1, window_bounds = array<i64: 160, 128>}, {pipeline_mode = #tpu.pipeline_mode<synchronous>, transform_indices = @transform_2, window_bounds = array<i64: 128, 128>}, {pipeline_mode = #tpu.pipeline_mode<synchronous>, transform_indices = @transform_3, window_bounds = array<i64: 2, 128>}, {pipeline_mode = #tpu.pipeline_mode<synchronous>, transform_indices = @transform_4, window_bounds = array<i64: 1, 128>}, {transform_indices = @transform_5, window_bounds = array<i64: 8, 128>}]} {
    %c0 = arith.constant 0 : index
    %c0_0 = arith.constant 0 : index
    %0 = vector.load %arg1[%c0, %c0_0] : memref<8x32xf32, #tpu.memory_space<vmem>>, vector<8x32xf32>
    %1 = arith.truncf %0 : vector<8x32xf32> to vector<8x32xbf16>
    %c0_1 = arith.constant 0 : index
    %c0_2 = arith.constant 0 : index
    %2 = vector.load %arg2[%c0_1, %c0_2] : memref<160x128xbf16, #tpu.memory_space<vmem>>, vector<32x128xbf16>
    %cst = arith.constant dense<0.000000e+00> : vector<8x128xf32>
    %3 = tpu.matmul %1, %2, %cst {dimension_numbers = #tpu.dot_dimension_numbers<[1], [0], [0], [1], [0, 0, 1, 1], [], []>} : vector<8x32xbf16>, vector<32x128xbf16>, vector<8x128xf32> -> vector<8x128xf32>
    %c0_3 = arith.constant 0 : index
    %c0_4 = arith.constant 0 : index
    %4 = vector.load %arg4[%c0_3, %c0_4] : memref<2x128xf32, #tpu.memory_space<vmem>>, vector<1x128xf32>
    %5 = vector.broadcast %4 : vector<1x128xf32> to vector<8x128xf32>
    %6 = arith.addf %3, %5 : vector<8x128xf32>
    %cst_5 = arith.constant 0.000000e+00 : f32
    %7 = vector.broadcast %cst_5 : f32 to vector<8x128xf32>
    %8 = arith.maximumf %6, %7 : vector<8x128xf32>
    %9 = arith.truncf %8 : vector<8x128xf32> to vector<8x128xbf16>
    %c32 = arith.constant 32 : index
    %c0_6 = arith.constant 0 : index
    %10 = vector.load %arg2[%c32, %c0_6] : memref<160x128xbf16, #tpu.memory_space<vmem>>, vector<128x128xbf16>
    %cst_7 = arith.constant dense<0.000000e+00> : vector<8x128xf32>
    %11 = tpu.matmul %9, %10, %cst_7 {dimension_numbers = #tpu.dot_dimension_numbers<[1], [0], [0], [1], [0, 0, 1, 1], [], []>} : vector<8x128xbf16>, vector<128x128xbf16>, vector<8x128xf32> -> vector<8x128xf32>
    %c1 = arith.constant 1 : index
    %c0_8 = arith.constant 0 : index
    %12 = vector.load %arg4[%c1, %c0_8] : memref<2x128xf32, #tpu.memory_space<vmem>>, vector<1x128xf32>
    %13 = vector.broadcast %12 : vector<1x128xf32> to vector<8x128xf32>
    %14 = arith.addf %11, %13 : vector<8x128xf32>
    %cst_9 = arith.constant 0.000000e+00 : f32
    %15 = vector.broadcast %cst_9 : f32 to vector<8x128xf32>
    %16 = arith.maximumf %14, %15 : vector<8x128xf32>
    %17 = arith.truncf %16 : vector<8x128xf32> to vector<8x128xbf16>
    %c0_10 = arith.constant 0 : index
    %c0_11 = arith.constant 0 : index
    %18 = vector.load %arg3[%c0_10, %c0_11] : memref<128x128xbf16, #tpu.memory_space<vmem>>, vector<128x128xbf16>
    %cst_12 = arith.constant dense<0.000000e+00> : vector<8x128xf32>
    %19 = tpu.matmul %17, %18, %cst_12 {dimension_numbers = #tpu.dot_dimension_numbers<[1], [0], [0], [1], [0, 0, 1, 1], [], []>} : vector<8x128xbf16>, vector<128x128xbf16>, vector<8x128xf32> -> vector<8x128xf32>
    %c0_13 = arith.constant 0 : index
    %c0_14 = arith.constant 0 : index
    %20 = vector.load %arg5[%c0_13, %c0_14] : memref<1x128xf32, #tpu.memory_space<vmem>>, vector<1x128xf32>
    %21 = vector.broadcast %20 : vector<1x128xf32> to vector<8x128xf32>
    %22 = arith.addf %19, %21 : vector<8x128xf32>
    %c0_15 = arith.constant 0 : index
    %c0_16 = arith.constant 0 : index
    %23 = vector.load %arg6[%c0_15, %c0_16] : memref<8x128xf32, #tpu.memory_space<vmem>>, vector<8x128xf32>
    tpu.vector_store %arg6[%c0_15, %c0_16], %22 {strides = array<i32>} : memref<8x128xf32, #tpu.memory_space<vmem>>, vector<8x128xf32>,
    return
  }
  func.func @transform_0(%arg0: i32) -> (i32, i32) {
    %c0_i32 = arith.constant 0 : i32
    %c0_i32_0 = arith.constant 0 : i32
    return %arg0, %c0_i32 : i32, i32
  }
  func.func @transform_1(%arg0: i32) -> (i32, i32) {
    %c0_i32 = arith.constant 0 : i32
    %c0_i32_0 = arith.constant 0 : i32
    %c0_i32_1 = arith.constant 0 : i32
    return %c0_i32, %c0_i32_0 : i32, i32
  }
  func.func @transform_2(%arg0: i32) -> (i32, i32) {
    %c0_i32 = arith.constant 0 : i32
    %c0_i32_0 = arith.constant 0 : i32
    %c0_i32_1 = arith.constant 0 : i32
    return %c0_i32, %c0_i32_0 : i32, i32
  }
  func.func @transform_3(%arg0: i32) -> (i32, i32) {
    %c0_i32 = arith.constant 0 : i32
    %c0_i32_0 = arith.constant 0 : i32
    %c0_i32_1 = arith.constant 0 : i32
    return %c0_i32, %c0_i32_0 : i32, i32
  }
  func.func @transform_4(%arg0: i32) -> (i32, i32) {
    %c0_i32 = arith.constant 0 : i32
    %c0_i32_0 = arith.constant 0 : i32
    %c0_i32_1 = arith.constant 0 : i32
    return %c0_i32, %c0_i32_0 : i32, i32
  }
  func.func @transform_5(%arg0: i32) -> (i32, i32) {
    %c0_i32 = arith.constant 0 : i32
    %c0_i32_0 = arith.constant 0 : i32
    return %arg0, %c0_i32 : i32, i32
  }
}

</mosaic_0001>

<bundles_post_ra>
// kernel: tpu_custom_call.1
= control target key start
LH: loop header
LB: loop body
LE: loop exit
PB: predicated region body
PF: predicated region fallthrough
CT: control target
= control target key end

     0   :  { %10 = vsyncpa [#allocation3], 0  ;;  %s546_s0 = inlined_call_operand.hbm [shape: f32[8,32], index: 0, kind: input, shape index: {}]   ;;  %s547_s1 = inlined_call_operand.hbm [shape: bf16[160,128], index: 1, kind: input, shape index: {}]   ;;  %s548_s2 = inlined_call_operand.hbm [shape: bf16[128,128], index: 2, kind: input, shape index: {}]   ;;  %s549_s3 = inlined_call_operand.vmem [shape: f32[2,128], index: 3, kind: input, shape index: {}]   ;;  %s550_s4 = inlined_call_operand.vmem [shape: f32[1,128], index: 4, kind: input, shape index: {}]   ;;  %s551_s5 = inlined_call_operand.hbm [shape: f32[8,128], index: 5, kind: output, shape index: {}]  }
   0x1   :  { %11 = vsyncpa [#allocation6], 0  ;;  %s28_s20 = sshll.u32 %s547_s1, 4  ;;  %s29_s20 = int_to_ptr.hbm [resolvable:$true] %s28_s20 }
   0x2   :  { %12 = vsyncpa [#allocation4], 0  ;;  %s489_s21 = smov [#allocation5]   ;;  %s18_s25 = sshll.u32 %s546_s0, 4  ;;  %s19_s25 = int_to_ptr.hbm [resolvable:$true] %s18_s25 }
   0x3   :  { %s30_s22 = sshll.u32 %s489_s21, 4  ;;  %s490_s26 = smov 64   ;;  %s31_s22 = int_to_ptr.vmem [resolvable:$true] %s30_s22 }
   0x4   :  { %s491_s27 = smov 4   ;;  %s492_s28 = smov [#allocation2]  }
   0x5   :  { %36 = dma.hbm_to_vmem [thread:$0]  %s29_s20, 1280, %s31_s22, [#allocation6], %s490_s26, %s490_s26, %s491_s27  }
   0x6   :  { %s20_s29 = sshll.u32 %s492_s28, 4  ;;  %s41_s7 = sshll.u32 %s548_s2, 4  ;;  %s21_s29 = int_to_ptr.vmem [resolvable:$true] %s20_s29  ;;  %s42_s7 = int_to_ptr.hbm [resolvable:$true] %s41_s7 }
   0x7   :  { %23 = dma.hbm_to_vmem [thread:$0]  %s19_s25, 128, %s21_s29, [#allocation3]  }
   0x8   :  { %s493_s1 = smov [#allocation7]  }
   0x9   :  { %s43_s8 = sshll.u32 %s493_s1, 4  ;;  %s44_s8 = int_to_ptr.vmem [resolvable:$true] %s43_s8 }
   0xa   :  { %49 = dma.hbm_to_vmem [thread:$0]  %s42_s7, 1024, %s44_s8, [#allocation6], %s490_s26, %s490_s26, %s491_s27  }
   0xb   :  { %483 = dma.done.wait [#allocation3], 128  }
   0xc   :  { %484 = vsyncadd [#allocation3], 4294967168 }
   0xd   :  { %485 = dma.done.wait [#allocation6], 2304  }
   0xe   :  { %486 = vsyncadd [#allocation6], 4294964992  ;;  %v361_v0 = vld [vmem:[#allocation5 + $0x8] sm:$0xff]  ;;  %v360_v2 = vld [vmem:[#allocation5] sm:$0xff]  ;;  %vm87_vm0 = vcmask 261120   ;;  %s494_s13 = smov [#allocation8]  }
   0xf   :  { %v369_v1 = vld [vmem:[#allocation5 + $0x48] sm:$0xff]  ;;  %97 = vmatpush.bf16.msra.mxu0 %v361_v0  ;;  %v67_v3 = vld [vmem:[#allocation2] sm:$0xff]  ;;  %v368_v4 = vld [vmem:[#allocation5 + $0x40] sm:$0xff]  ;;  %s274_s14 = sshll.u32 %s494_s13, 4  ;;  %s276_s17 = sshll.u32 %s551_s5, 4  ;;  %s275_s14 = int_to_ptr.vmem [resolvable:$true] %s274_s14  ;;  %s277_s17 = int_to_ptr.hbm [resolvable:$true] %s276_s17 }
  0x10   :  { %172 = vmatpush.bf16.msra.mxu1 %v369_v1  ;;  %v68_v5 = vpack.c.bf16 %v67_v3, %v67_v3  ;;  %v367_v6 = vld [vmem:[#allocation5 + $0x38] sm:$0xff]  ;;  %v366_v7 = vld [vmem:[#allocation5 + $0x30] sm:$0xff]  ;;  %v365_v8 = vld [vmem:[#allocation5 + $0x28] sm:$0xff] }
  0x11   :  { %v364_v9 = vld [vmem:[#allocation5 + $0x20] sm:$0xff]  ;;  %v363_v10 = vld [vmem:[#allocation5 + $0x18] sm:$0xff]  ;;  %v362_v11 = vld [vmem:[#allocation5 + $0x10] sm:$0xff] }
  0x12   :  { %v377_v12 = vld [vmem:[#allocation7 + $0x38] sm:$0xff]  ;;  %v376_v13 = vld [vmem:[#allocation7 + $0x30] sm:$0xff]  ;;  %v375_v14 = vld [vmem:[#allocation7 + $0x28] sm:$0xff] }
  0x13   :  { %98 = vmatpush.bf16.msra.mxu0 %v360_v2  ;;  %255 = vmatpush.bf16.msra.mxu2 %v377_v12  ;;  %v374_v15 = vld [vmem:[#allocation7 + $0x20] sm:$0xff]  ;;  %v373_v16 = vld [vmem:[#allocation7 + $0x18] sm:$0xff]  ;;  %v372_v17 = vld [vmem:[#allocation7 + $0x10] sm:$0xff] }
  0x14   :  { %173 = vmatpush.bf16.msra.mxu1 %v368_v4  ;;  %v384_v18 = vld [vmem:[%s549_s3] ss:$0 sm:$0xff]  ;;  %v370_v25 = vld [vmem:[#allocation7] sm:$0xff]  ;;  %v385_v26 = vld [vmem:[%s549_s3 + $0x1] ss:$0 sm:$0xff] }
  0x15   :  { %v371_v24 = vld [vmem:[#allocation7 + $0x8] sm:$0xff] }
  0x16   :  { %295 = vmatmul.msk.bf16.vlgmr.msra.gmra.mxu0 %vm87_vm0, %v68_v5  ;;  %v386_v32 = vld [vmem:[%s550_s4] ss:$0 sm:$0xff] }
  0x17   :  { %256 = vmatpush.bf16.msra.mxu2 %v376_v13 }
  0x18   :  { %174 = vmatpush.bf16.msra.mxu1 %v367_v6 }
  0x1b   :  { %257 = vmatpush.bf16.msra.mxu2 %v375_v14 }
  0x1c   :  { %175 = vmatpush.bf16.msra.mxu1 %v366_v7 }
  0x1f   :  { %258 = vmatpush.bf16.msra.mxu2 %v374_v15 }
  0x20   :  { %176 = vmatpush.bf16.msra.mxu1 %v365_v8 }
  0x23   :  { %259 = vmatpush.bf16.msra.mxu2 %v373_v16 }
  0x24   :  { %177 = vmatpush.bf16.msra.mxu1 %v364_v9 }
  0x27   :  { %260 = vmatpush.bf16.msra.mxu2 %v372_v17 }
  0x28   :  { %178 = vmatpush.bf16.msra.mxu1 %v363_v10 }
  0x2b   :  { %261 = vmatpush.bf16.msra.mxu2 %v371_v24 }
  0x2c   :  { %179 = vmatpush.bf16.msra.mxu1 %v362_v11 }
  0x2f   :  { %262 = vmatpush.bf16.msra.mxu2 %v370_v25 }
  0x93   :  { %v100_v19 = vpop.f32.mrf.mxu0 }
  0x94   :  { %v101_v20 = vadd.f32 %v384_v18, %v100_v19 }
  0x96   :  { %v104_v21 = vmax.f32 %v101_v20, 0.0 }
  0x98   :  { %v105_v22 = vpack.c.bf16 %v104_v21, %v104_v21 }
  0x9a   :  { %180 = vmatmul.bf16.vlgmr.msra.gmra.mxu1 %v105_v22 }
  0x9b   :  { %v102_v23 = vpop.f32.mrf.mxu0 }
 0x117   :  { %v181_v27 = vpop.f32.mrf.mxu1 }
 0x118   :  { %v182_v28 = vadd.f32 %v385_v26, %v181_v27 }
 0x11a   :  { %v185_v29 = vmax.f32 %v182_v28, 0.0 }
 0x11c   :  { %v186_v30 = vpack.c.bf16 %v185_v29, %v185_v29 }
 0x11e   :  { %263 = vmatmul.bf16.vlgmr.msra.gmra.mxu2 %v186_v30 }
 0x11f   :  { %v183_v31 = vpop.f32.mrf.mxu1 }
 0x1a1   :  { %v264_v33 = vpop.f32.mrf.mxu2 }
 0x1a2   :  { %v265_v34 = vadd.f32 %v386_v32, %v264_v33 }
 0x1a4   :  { %268 = vst [vmem:[#allocation8] sm:$0xff] %v265_v34 }
 0x1a5   :  { %279 = dma.vmem_to_hbm [thread:$0]  %s275_s14, 128, %s277_s17, [#allocation4]  }
 0x1a9   :  { %v266_v35 = vpop.f32.mrf.mxu2 }
 0x1aa   :  { %487 = dma.done.wait [#allocation4], 128  }
 0x1ab   :  { %488 = vsyncadd [#allocation4], 4294967168 }
 0x1ac   :  { %284 = vsyncpa [#allocation3], 1 }
 0x1ad   :  { %285 = vsyncpa [#allocation6], 1 }
 0x1ae   :  { %286 = vsyncpa [#allocation4], 1 }

</bundles_post_ra>
